<compile_context>
chip_gen: v7x
topology: tpu7x:2x2x1
jax: 0.10.0
libtpu: 0.0.40
codegen_flags: <defaults>
</compile_context>

<pallas_src>
import functools

import jax
import jax.numpy as jnp
from jax import lax
from jax.experimental import pallas as pl
from jax.experimental.pallas import tpu as pltpu


def _round_up(x, m):
    return (x + m - 1) // m * m


def _padded_buf_bytes(shape, itemsize):
    """Rough VMEM bytes for one buffer (last two dims padded to (8, 128))."""
    if len(shape) == 1:
        shape = (1,) + tuple(shape)
    lead = 1
    for d in shape[:-2]:
        lead *= d
    return lead * _round_up(shape[-2], 8) * _round_up(shape[-1], 128) * itemsize


def _pick_batch_block(n):
    """Images per grid step.

    Amortizes the ~600-cycle per-grid-step overhead over several images, but
    keeps at least two grid steps so dimension_semantics=("parallel",) can
    split the batch across v7x's two TensorCores (on v5e/v6e it is neutral).
    Capped so the im2col scratch / pooling matrix stay small in VMEM.
    """
    if n <= 2:
        return 1
    blk = min(n // 2, 16)
    while blk > 1 and n % blk:      # prefer exact division (no batch padding)
        blk -= 1
    return blk


def _conv_relu_gap_kernel(x_ref, w_ref, b_ref, p_ref, o_ref, stage_ref, col_ref,
                          *, batch_blk, cin, cpad, n_kh, n_kw, img_h, img_w,
                          wp, ph, pw, length):
    """One batch-block of images per grid step.

    x_ref    : (B, Cin, H*W) f32     raw (un-padded) images, flat spatial on lanes
    w_ref    : (Cout, cpad*KH*KW) bf16  conv weights, (kh,kw)-major / channel-minor
    b_ref    : (Cout, 1) f32         bias
    p_ref    : (B*L, B) bf16         block-diag pooling matrix, mask/(H*W) folded in
    o_ref    : (1, Cout, B) f32      pooled features, batch on lanes
    stage_ref: (cpad, FL) f32        zero-padded flat-spatial staging buffer
    col_ref  : (cpad*KH*KW, B*L) bf16   im2col matrix for the whole block
    """
    # Zero the staging buffer; only the interior rows are overwritten below, so
    # the 'SAME' zero-padding ring / lane tail / padded channel row stay zero.
    # Unconditional (not pl.when(pid == 0)) so it is also correct when the
    # "parallel" batch axis is split across v7x's two TensorCores.
    stage_ref[...] = jnp.zeros_like(stage_ref)

    for b in range(batch_blk):
        xb = x_ref[b]                                        # (Cin, H*W) f32
        # In-kernel 'SAME' zero padding: scatter the H image rows into the flat
        # padded-spatial staging buffer at stride Wp (all offsets static).
        for hh in range(img_h):
            dst = (hh + ph) * wp + pw
            stage_ref[0:cin, dst:dst + img_w] = xb[:, hh * img_w:(hh + 1) * img_w]
        # im2col: KH*KW static lane-shifted wide copies (f32 -> bf16 cast) into
        # this image's L-slab; col lane offsets are multiples of 128 and each
        # tap block is a whole packed-bf16 sublane pair (cpad rows).
        for kh in range(n_kh):
            for kw in range(n_kw):
                t = kh * n_kw + kw
                off = kh * wp + kw
                col_ref[t * cpad:(t + 1) * cpad, b * length:(b + 1) * length] = (
                    stage_ref[:, off:off + length].astype(jnp.bfloat16))

    # One MXU contraction for the whole block: (Cout, K) @ (K, B*L), f32 accum.
    y = jnp.dot(w_ref[...], col_ref[...], preferred_element_type=jnp.float32)
    y = jnp.maximum(y + b_ref[...], 0.0)                     # bias + ReLU (f32 VPU)
    # AdaptiveAvgPool2d((1,1)) + double squeeze as a second small MXU op:
    # (Cout, B*L) @ (B*L, B) -> lane-dense (Cout, B); the valid-slot mask and
    # the 1/(H*W) scale are folded into P, so padded/tail slots contribute 0.
    pooled = jnp.dot(y.astype(jnp.bfloat16), p_ref[...],
                     preferred_element_type=jnp.float32)
    o_ref[0] = pooled


@jax.jit
def easy_model_forward(x, w, b):
    """x: (N, Cin, H, W) float32 NCHW -> (N, Cout) pooled features."""
    N, Cin, H, W = x.shape
    Cout, _, KH, KW = w.shape
    ph, pw = KH // 2, KW // 2
    Wp = W + 2 * pw

    # cpad: channel axis rounded to a whole packed-bf16 sublane pair.
    cpad = _round_up(max(Cin, 2), 2)
    Kdim = KH * KW * cpad

    # L = conv "slots" p = h*Wp + w computed per image; multiple of 128 so the
    # lane axis is unmasked, >= 256 to fill the v6e/v7x MXU.
    L = _round_up(max((H - 1) * Wp + W, 256), 128)
    max_off = (KH - 1) * Wp + (KW - 1)
    FL = _round_up(L + max_off, 128)

    B = _pick_batch_block(N)
    G = N // B

    # Raw activations: free row-major reshape only -- no padded copy is written
    # to HBM; the 'SAME' zero padding happens inside the kernel.
    x3 = x.reshape(N, Cin, H * W)

    # Weights -> (Cout, KH*KW*cpad), (kh,kw)-major / channel-minor, zero-padded
    # channel rows, bf16 for the MXU.
    w_t = jnp.transpose(w, (0, 2, 3, 1))                      # (Cout, KH, KW, Cin)
    w_t = jnp.pad(w_t, ((0, 0), (0, 0), (0, 0), (0, cpad - Cin)))
    w2 = w_t.reshape(Cout, Kdim).astype(jnp.bfloat16)
    b2 = b.reshape(Cout, 1).astype(jnp.float32)

    # Block-diagonal pooling matrix: P[b*L + p, b] = valid(p) / (H*W).
    p_idx = jnp.arange(L)
    valid = ((p_idx // Wp) < H) & ((p_idx % Wp) < W)
    mcol = valid.astype(jnp.float32) / float(H * W)           # (L,)
    P = jnp.kron(jnp.eye(B, dtype=jnp.float32), mcol[:, None]).astype(jnp.bfloat16)

    kernel = functools.partial(
        _conv_relu_gap_kernel, batch_blk=B, cin=Cin, cpad=cpad, n_kh=KH, n_kw=KW,
        img_h=H, img_w=W, wp=Wp, ph=ph, pw=pw, length=L)

    # Right-sized VMEM budget: double-buffered blocks + scratch, 4x headroom,
    # floored at 4 MiB -- well inside v7x's 64 MiB physical VMEM.
    blk_bytes = (_padded_buf_bytes((B, Cin, H * W), 4)
                 + _padded_buf_bytes((Cout, Kdim), 2)
                 + _padded_buf_bytes((Cout, 1), 4)
                 + _padded_buf_bytes((B * L, B), 2)
                 + _padded_buf_bytes((1, Cout, B), 4))
    scratch_bytes = (_padded_buf_bytes((cpad, FL), 4)
                     + _padded_buf_bytes((Kdim, B * L), 2))
    vmem_limit = int(min(max(4 << 20, 4 * (2 * blk_bytes + scratch_bytes)), 32 << 20))

    out = pl.pallas_call(
        kernel,
        out_shape=jax.ShapeDtypeStruct((G, Cout, B), jnp.float32),
        grid=(G,),
        in_specs=[
            pl.BlockSpec((B, Cin, H * W), lambda g: (g, 0, 0)),
            pl.BlockSpec((Cout, Kdim), lambda g: (0, 0)),
            pl.BlockSpec((Cout, 1), lambda g: (0, 0)),
            pl.BlockSpec((B * L, B), lambda g: (0, 0)),
        ],
        out_specs=pl.BlockSpec((1, Cout, B), lambda g: (g, 0, 0)),
        scratch_shapes=[
            pltpu.VMEM((cpad, FL), jnp.float32),       # padded-image staging
            pltpu.VMEM((Kdim, B * L), jnp.bfloat16),   # im2col matrix
        ],
        compiler_params=pltpu.CompilerParams(
            dimension_semantics=("parallel",),          # batch across v7x's 2 TCs
            vmem_limit_bytes=vmem_limit,
        ),
    )(x3, w2, b2, P)

    # (G, Cout, B) with batch on lanes -> (N, Cout); matches the two squeezes.
    return out.transpose(0, 2, 1).reshape(N, Cout)


def reference_forward(x, w, b):
    y = lax.conv_general_dilated(
        x, w, window_strides=(1, 1), padding='SAME',
        dimension_numbers=('NCHW', 'OIHW', 'NCHW'))
    y = jax.nn.relu(y + b[None, :, None, None])
    return jnp.mean(y, axis=(2, 3))


if __name__ == "__main__":
    # Small deterministic shapes: batch=2, channels=3, spatial=16, C_out=8.
    key = jax.random.PRNGKey(0)
    kx, kweights, kb = jax.random.split(key, 3)
    N, Cin, H, W = 2, 3, 16, 16
    Cout, KH, KW = 8, 3, 3

    x = jax.random.normal(kx, (N, Cin, H, W), dtype=jnp.float32)
    w = jax.random.normal(kweights, (Cout, Cin, KH, KW), dtype=jnp.float32) * 0.1
    b = jax.random.normal(kb, (Cout,), dtype=jnp.float32) * 0.1

    out = easy_model_forward(x, w, b)
    out = jax.block_until_ready(out)

    ref = reference_forward(x, w, b)
    assert out.shape == (N, Cout)
    # bf16 MXU operands with f32 accumulation: tolerance loosened vs the f32 ref.
    assert jnp.allclose(out, ref, rtol=1e-2, atol=1e-2), "mismatch vs reference"

    print("KERNEL_OK")
</pallas_src>

<mosaic_0001>
module attributes {stable_mosaic.version = 11 : i64} {
  func.func @_conv_relu_gap_kernel(%arg0: i32, %arg1: memref<1x3x256xf32, #tpu.memory_space<vmem>>, %arg2: memref<8x36xbf16, #tpu.memory_space<vmem>>, %arg3: memref<8x1xf32, #tpu.memory_space<vmem>>, %arg4: memref<384x1xbf16, #tpu.memory_space<vmem>>, %arg5: memref<1x8x1xf32, #tpu.memory_space<vmem>>, %arg6: memref<4x512xf32, #tpu.memory_space<vmem>>, %arg7: memref<36x384xbf16, #tpu.memory_space<vmem>>) attributes {dimension_semantics = [#tpu.dimension_semantics<parallel>], iteration_bounds = array<i64: 2>, scalar_prefetch = 0 : i64, scratch_operands = 2 : i64, tpu.core_type = #tpu.core_type<tc>, window_params = [{transform_indices = @transform_0, window_bounds = array<i64: 1, 3, 256>}, {pipeline_mode = #tpu.pipeline_mode<synchronous>, transform_indices = @transform_1, window_bounds = array<i64: 8, 36>}, {pipeline_mode = #tpu.pipeline_mode<synchronous>, transform_indices = @transform_2, window_bounds = array<i64: 8, 1>}, {pipeline_mode = #tpu.pipeline_mode<synchronous>, transform_indices = @transform_3, window_bounds = array<i64: 384, 1>}, {transform_indices = @transform_4, window_bounds = array<i64: 1, 8, 1>}]} {
    %cst = arith.constant 0.000000e+00 : f32
    %0 = vector.broadcast %cst : f32 to vector<4x512xf32>
    %c0 = arith.constant 0 : index
    %c0_0 = arith.constant 0 : index
    %1 = vector.load %arg6[%c0, %c0_0] : memref<4x512xf32, #tpu.memory_space<vmem>>, vector<4x512xf32>
    tpu.vector_store %arg6[%c0, %c0_0], %0 {strides = array<i32>} : memref<4x512xf32, #tpu.memory_space<vmem>>, vector<4x512xf32>,
    %c0_1 = arith.constant 0 : index
    %c0_2 = arith.constant 0 : index
    %c0_3 = arith.constant 0 : index
    %2 = vector.load %arg1[%c0_1, %c0_2, %c0_3] : memref<1x3x256xf32, #tpu.memory_space<vmem>>, vector<1x3x256xf32>
    %3 = vector.shape_cast %2 : vector<1x3x256xf32> to vector<3x256xf32>
    %4 = vector.extract_strided_slice %3 {offsets = [0, 0], sizes = [3, 16], strides = [1, 1]} : vector<3x256xf32> to vector<3x16xf32>
    %c0_4 = arith.constant 0 : index
    %c19 = arith.constant 19 : index
    %5 = vector.load %arg6[%c0_4, %c19] : memref<4x512xf32, #tpu.memory_space<vmem>>, vector<3x16xf32>
    tpu.vector_store %arg6[%c0_4, %c19], %4 {strides = array<i32>} : memref<4x512xf32, #tpu.memory_space<vmem>>, vector<3x16xf32>,
    %6 = vector.extract_strided_slice %3 {offsets = [0, 16], sizes = [3, 16], strides = [1, 1]} : vector<3x256xf32> to vector<3x16xf32>
    %c0_5 = arith.constant 0 : index
    %c37 = arith.constant 37 : index
    %7 = vector.load %arg6[%c0_5, %c37] : memref<4x512xf32, #tpu.memory_space<vmem>>, vector<3x16xf32>
    tpu.vector_store %arg6[%c0_5, %c37], %6 {strides = array<i32>} : memref<4x512xf32, #tpu.memory_space<vmem>>, vector<3x16xf32>,
    %8 = vector.extract_strided_slice %3 {offsets = [0, 32], sizes = [3, 16], strides = [1, 1]} : vector<3x256xf32> to vector<3x16xf32>
    %c0_6 = arith.constant 0 : index
    %c55 = arith.constant 55 : index
    %9 = vector.load %arg6[%c0_6, %c55] : memref<4x512xf32, #tpu.memory_space<vmem>>, vector<3x16xf32>
    tpu.vector_store %arg6[%c0_6, %c55], %8 {strides = array<i32>} : memref<4x512xf32, #tpu.memory_space<vmem>>, vector<3x16xf32>,
    %10 = vector.extract_strided_slice %3 {offsets = [0, 48], sizes = [3, 16], strides = [1, 1]} : vector<3x256xf32> to vector<3x16xf32>
    %c0_7 = arith.constant 0 : index
    %c73 = arith.constant 73 : index
    %11 = vector.load %arg6[%c0_7, %c73] : memref<4x512xf32, #tpu.memory_space<vmem>>, vector<3x16xf32>
    tpu.vector_store %arg6[%c0_7, %c73], %10 {strides = array<i32>} : memref<4x512xf32, #tpu.memory_space<vmem>>, vector<3x16xf32>,
    %12 = vector.extract_strided_slice %3 {offsets = [0, 64], sizes = [3, 16], strides = [1, 1]} : vector<3x256xf32> to vector<3x16xf32>
    %c0_8 = arith.constant 0 : index
    %c91 = arith.constant 91 : index
    %13 = vector.load %arg6[%c0_8, %c91] : memref<4x512xf32, #tpu.memory_space<vmem>>, vector<3x16xf32>
    tpu.vector_store %arg6[%c0_8, %c91], %12 {strides = array<i32>} : memref<4x512xf32, #tpu.memory_space<vmem>>, vector<3x16xf32>,
    %14 = vector.extract_strided_slice %3 {offsets = [0, 80], sizes = [3, 16], strides = [1, 1]} : vector<3x256xf32> to vector<3x16xf32>
    %c0_9 = arith.constant 0 : index
    %c109 = arith.constant 109 : index
    %15 = vector.load %arg6[%c0_9, %c109] : memref<4x512xf32, #tpu.memory_space<vmem>>, vector<3x16xf32>
    tpu.vector_store %arg6[%c0_9, %c109], %14 {strides = array<i32>} : memref<4x512xf32, #tpu.memory_space<vmem>>, vector<3x16xf32>,
    %16 = vector.extract_strided_slice %3 {offsets = [0, 96], sizes = [3, 16], strides = [1, 1]} : vector<3x256xf32> to vector<3x16xf32>
    %c0_10 = arith.constant 0 : index
    %c127 = arith.constant 127 : index
    %17 = vector.load %arg6[%c0_10, %c127] : memref<4x512xf32, #tpu.memory_space<vmem>>, vector<3x16xf32>
    tpu.vector_store %arg6[%c0_10, %c127], %16 {strides = array<i32>} : memref<4x512xf32, #tpu.memory_space<vmem>>, vector<3x16xf32>,
    %18 = vector.extract_strided_slice %3 {offsets = [0, 112], sizes = [3, 16], strides = [1, 1]} : vector<3x256xf32> to vector<3x16xf32>
    %c0_11 = arith.constant 0 : index
    %c145 = arith.constant 145 : index
    %19 = vector.load %arg6[%c0_11, %c145] : memref<4x512xf32, #tpu.memory_space<vmem>>, vector<3x16xf32>
    tpu.vector_store %arg6[%c0_11, %c145], %18 {strides = array<i32>} : memref<4x512xf32, #tpu.memory_space<vmem>>, vector<3x16xf32>,
    %20 = vector.extract_strided_slice %3 {offsets = [0, 128], sizes = [3, 16], strides = [1, 1]} : vector<3x256xf32> to vector<3x16xf32>
    %c0_12 = arith.constant 0 : index
    %c163 = arith.constant 163 : index
    %21 = vector.load %arg6[%c0_12, %c163] : memref<4x512xf32, #tpu.memory_space<vmem>>, vector<3x16xf32>
    tpu.vector_store %arg6[%c0_12, %c163], %20 {strides = array<i32>} : memref<4x512xf32, #tpu.memory_space<vmem>>, vector<3x16xf32>,
    %22 = vector.extract_strided_slice %3 {offsets = [0, 144], sizes = [3, 16], strides = [1, 1]} : vector<3x256xf32> to vector<3x16xf32>
    %c0_13 = arith.constant 0 : index
    %c181 = arith.constant 181 : index
    %23 = vector.load %arg6[%c0_13, %c181] : memref<4x512xf32, #tpu.memory_space<vmem>>, vector<3x16xf32>
    tpu.vector_store %arg6[%c0_13, %c181], %22 {strides = array<i32>} : memref<4x512xf32, #tpu.memory_space<vmem>>, vector<3x16xf32>,
    %24 = vector.extract_strided_slice %3 {offsets = [0, 160], sizes = [3, 16], strides = [1, 1]} : vector<3x256xf32> to vector<3x16xf32>
    %c0_14 = arith.constant 0 : index
    %c199 = arith.constant 199 : index
    %25 = vector.load %arg6[%c0_14, %c199] : memref<4x512xf32, #tpu.memory_space<vmem>>, vector<3x16xf32>
    tpu.vector_store %arg6[%c0_14, %c199], %24 {strides = array<i32>} : memref<4x512xf32, #tpu.memory_space<vmem>>, vector<3x16xf32>,
    %26 = vector.extract_strided_slice %3 {offsets = [0, 176], sizes = [3, 16], strides = [1, 1]} : vector<3x256xf32> to vector<3x16xf32>
    %c0_15 = arith.constant 0 : index
    %c217 = arith.constant 217 : index
    %27 = vector.load %arg6[%c0_15, %c217] : memref<4x512xf32, #tpu.memory_space<vmem>>, vector<3x16xf32>
    tpu.vector_store %arg6[%c0_15, %c217], %26 {strides = array<i32>} : memref<4x512xf32, #tpu.memory_space<vmem>>, vector<3x16xf32>,
    %28 = vector.extract_strided_slice %3 {offsets = [0, 192], sizes = [3, 16], strides = [1, 1]} : vector<3x256xf32> to vector<3x16xf32>
    %c0_16 = arith.constant 0 : index
    %c235 = arith.constant 235 : index
    %29 = vector.load %arg6[%c0_16, %c235] : memref<4x512xf32, #tpu.memory_space<vmem>>, vector<3x16xf32>
    tpu.vector_store %arg6[%c0_16, %c235], %28 {strides = array<i32>} : memref<4x512xf32, #tpu.memory_space<vmem>>, vector<3x16xf32>,
    %30 = vector.extract_strided_slice %3 {offsets = [0, 208], sizes = [3, 16], strides = [1, 1]} : vector<3x256xf32> to vector<3x16xf32>
    %c0_17 = arith.constant 0 : index
    %c253 = arith.constant 253 : index
    %31 = vector.load %arg6[%c0_17, %c253] : memref<4x512xf32, #tpu.memory_space<vmem>>, vector<3x16xf32>
    tpu.vector_store %arg6[%c0_17, %c253], %30 {strides = array<i32>} : memref<4x512xf32, #tpu.memory_space<vmem>>, vector<3x16xf32>,
    %32 = vector.extract_strided_slice %3 {offsets = [0, 224], sizes = [3, 16], strides = [1, 1]} : vector<3x256xf32> to vector<3x16xf32>
    %c0_18 = arith.constant 0 : index
    %c271 = arith.constant 271 : index
    %33 = vector.load %arg6[%c0_18, %c271] : memref<4x512xf32, #tpu.memory_space<vmem>>, vector<3x16xf32>
    tpu.vector_store %arg6[%c0_18, %c271], %32 {strides = array<i32>} : memref<4x512xf32, #tpu.memory_space<vmem>>, vector<3x16xf32>,
    %34 = vector.extract_strided_slice %3 {offsets = [0, 240], sizes = [3, 16], strides = [1, 1]} : vector<3x256xf32> to vector<3x16xf32>
    %c0_19 = arith.constant 0 : index
    %c289 = arith.constant 289 : index
    %35 = vector.load %arg6[%c0_19, %c289] : memref<4x512xf32, #tpu.memory_space<vmem>>, vector<3x16xf32>
    tpu.vector_store %arg6[%c0_19, %c289], %34 {strides = array<i32>} : memref<4x512xf32, #tpu.memory_space<vmem>>, vector<3x16xf32>,
    %c0_20 = arith.constant 0 : index
    %c0_21 = arith.constant 0 : index
    %36 = vector.load %arg6[%c0_20, %c0_21] : memref<4x512xf32, #tpu.memory_space<vmem>>, vector<4x384xf32>
    %37 = arith.truncf %36 : vector<4x384xf32> to vector<4x384xbf16>
    %c0_22 = arith.constant 0 : index
    %c0_23 = arith.constant 0 : index
    %38 = vector.load %arg7[%c0_22, %c0_23] : memref<36x384xbf16, #tpu.memory_space<vmem>>, vector<4x384xbf16>
    tpu.vector_store %arg7[%c0_22, %c0_23], %37 {strides = array<i32>} : memref<36x384xbf16, #tpu.memory_space<vmem>>, vector<4x384xbf16>,
    %c0_24 = arith.constant 0 : index
    %c1 = arith.constant 1 : index
    %39 = vector.load %arg6[%c0_24, %c1] : memref<4x512xf32, #tpu.memory_space<vmem>>, vector<4x384xf32>
    %40 = arith.truncf %39 : vector<4x384xf32> to vector<4x384xbf16>
    %c4 = arith.constant 4 : index
    %c0_25 = arith.constant 0 : index
    %41 = vector.load %arg7[%c4, %c0_25] : memref<36x384xbf16, #tpu.memory_space<vmem>>, vector<4x384xbf16>
    tpu.vector_store %arg7[%c4, %c0_25], %40 {strides = array<i32>} : memref<36x384xbf16, #tpu.memory_space<vmem>>, vector<4x384xbf16>,
    %c0_26 = arith.constant 0 : index
    %c2 = arith.constant 2 : index
    %42 = vector.load %arg6[%c0_26, %c2] : memref<4x512xf32, #tpu.memory_space<vmem>>, vector<4x384xf32>
    %43 = arith.truncf %42 : vector<4x384xf32> to vector<4x384xbf16>
    %c8 = arith.constant 8 : index
    %c0_27 = arith.constant 0 : index
    %44 = vector.load %arg7[%c8, %c0_27] : memref<36x384xbf16, #tpu.memory_space<vmem>>, vector<4x384xbf16>
    tpu.vector_store %arg7[%c8, %c0_27], %43 {strides = array<i32>} : memref<36x384xbf16, #tpu.memory_space<vmem>>, vector<4x384xbf16>,
    %c0_28 = arith.constant 0 : index
    %c18 = arith.constant 18 : index
    %45 = vector.load %arg6[%c0_28, %c18] : memref<4x512xf32, #tpu.memory_space<vmem>>, vector<4x384xf32>
    %46 = arith.truncf %45 : vector<4x384xf32> to vector<4x384xbf16>
    %c12 = arith.constant 12 : index
    %c0_29 = arith.constant 0 : index
    %47 = vector.load %arg7[%c12, %c0_29] : memref<36x384xbf16, #tpu.memory_space<vmem>>, vector<4x384xbf16>
    tpu.vector_store %arg7[%c12, %c0_29], %46 {strides = array<i32>} : memref<36x384xbf16, #tpu.memory_space<vmem>>, vector<4x384xbf16>,
    %c0_30 = arith.constant 0 : index
    %c19_31 = arith.constant 19 : index
    %48 = vector.load %arg6[%c0_30, %c19_31] : memref<4x512xf32, #tpu.memory_space<vmem>>, vector<4x384xf32>
    %49 = arith.truncf %48 : vector<4x384xf32> to vector<4x384xbf16>
    %c16 = arith.constant 16 : index
    %c0_32 = arith.constant 0 : index
    %50 = vector.load %arg7[%c16, %c0_32] : memref<36x384xbf16, #tpu.memory_space<vmem>>, vector<4x384xbf16>
    tpu.vector_store %arg7[%c16, %c0_32], %49 {strides = array<i32>} : memref<36x384xbf16, #tpu.memory_space<vmem>>, vector<4x384xbf16>,
    %c0_33 = arith.constant 0 : index
    %c20 = arith.constant 20 : index
    %51 = vector.load %arg6[%c0_33, %c20] : memref<4x512xf32, #tpu.memory_space<vmem>>, vector<4x384xf32>
    %52 = arith.truncf %51 : vector<4x384xf32> to vector<4x384xbf16>
    %c20_34 = arith.constant 20 : index
    %c0_35 = arith.constant 0 : index
    %53 = vector.load %arg7[%c20_34, %c0_35] : memref<36x384xbf16, #tpu.memory_space<vmem>>, vector<4x384xbf16>
    tpu.vector_store %arg7[%c20_34, %c0_35], %52 {strides = array<i32>} : memref<36x384xbf16, #tpu.memory_space<vmem>>, vector<4x384xbf16>,
    %c0_36 = arith.constant 0 : index
    %c36 = arith.constant 36 : index
    %54 = vector.load %arg6[%c0_36, %c36] : memref<4x512xf32, #tpu.memory_space<vmem>>, vector<4x384xf32>
    %55 = arith.truncf %54 : vector<4x384xf32> to vector<4x384xbf16>
    %c24 = arith.constant 24 : index
    %c0_37 = arith.constant 0 : index
    %56 = vector.load %arg7[%c24, %c0_37] : memref<36x384xbf16, #tpu.memory_space<vmem>>, vector<4x384xbf16>
    tpu.vector_store %arg7[%c24, %c0_37], %55 {strides = array<i32>} : memref<36x384xbf16, #tpu.memory_space<vmem>>, vector<4x384xbf16>,
    %c0_38 = arith.constant 0 : index
    %c37_39 = arith.constant 37 : index
    %57 = vector.load %arg6[%c0_38, %c37_39] : memref<4x512xf32, #tpu.memory_space<vmem>>, vector<4x384xf32>
    %58 = arith.truncf %57 : vector<4x384xf32> to vector<4x384xbf16>
    %c28 = arith.constant 28 : index
    %c0_40 = arith.constant 0 : index
    %59 = vector.load %arg7[%c28, %c0_40] : memref<36x384xbf16, #tpu.memory_space<vmem>>, vector<4x384xbf16>
    tpu.vector_store %arg7[%c28, %c0_40], %58 {strides = array<i32>} : memref<36x384xbf16, #tpu.memory_space<vmem>>, vector<4x384xbf16>,
    %c0_41 = arith.constant 0 : index
    %c38 = arith.constant 38 : index
    %60 = vector.load %arg6[%c0_41, %c38] : memref<4x512xf32, #tpu.memory_space<vmem>>, vector<4x384xf32>
    %61 = arith.truncf %60 : vector<4x384xf32> to vector<4x384xbf16>
    %c32 = arith.constant 32 : index
    %c0_42 = arith.constant 0 : index
    %62 = vector.load %arg7[%c32, %c0_42] : memref<36x384xbf16, #tpu.memory_space<vmem>>, vector<4x384xbf16>
    tpu.vector_store %arg7[%c32, %c0_42], %61 {strides = array<i32>} : memref<36x384xbf16, #tpu.memory_space<vmem>>, vector<4x384xbf16>,
    %c0_43 = arith.constant 0 : index
    %c0_44 = arith.constant 0 : index
    %63 = vector.load %arg2[%c0_43, %c0_44] : memref<8x36xbf16, #tpu.memory_space<vmem>>, vector<8x36xbf16>
    %c0_45 = arith.constant 0 : index
    %c0_46 = arith.constant 0 : index
    %64 = vector.load %arg7[%c0_45, %c0_46] : memref<36x384xbf16, #tpu.memory_space<vmem>>, vector<36x384xbf16>
    %cst_47 = arith.constant dense<0.000000e+00> : vector<8x384xf32>
    %65 = tpu.matmul %63, %64, %cst_47 {dimension_numbers = #tpu.dot_dimension_numbers<[1], [0], [0], [1], [0, 0, 1, 1], [], []>} : vector<8x36xbf16>, vector<36x384xbf16>, vector<8x384xf32> -> vector<8x384xf32>
    %c0_48 = arith.constant 0 : index
    %c0_49 = arith.constant 0 : index
    %66 = vector.load %arg3[%c0_48, %c0_49] : memref<8x1xf32, #tpu.memory_space<vmem>>, vector<8x1xf32>
    %67 = vector.broadcast %66 : vector<8x1xf32> to vector<8x384xf32>
    %68 = arith.addf %65, %67 : vector<8x384xf32>
    %cst_50 = arith.constant 0.000000e+00 : f32
    %69 = vector.broadcast %cst_50 : f32 to vector<8x384xf32>
    %70 = arith.maximumf %68, %69 : vector<8x384xf32>
    %71 = arith.truncf %70 : vector<8x384xf32> to vector<8x384xbf16>
    %c0_51 = arith.constant 0 : index
    %c0_52 = arith.constant 0 : index
    %72 = vector.load %arg4[%c0_51, %c0_52] : memref<384x1xbf16, #tpu.memory_space<vmem>>, vector<384x1xbf16>
    %cst_53 = arith.constant dense<0.000000e+00> : vector<8x1xf32>
    %73 = tpu.matmul %71, %72, %cst_53 {dimension_numbers = #tpu.dot_dimension_numbers<[1], [0], [0], [1], [0, 0, 1, 1], [], []>} : vector<8x384xbf16>, vector<384x1xbf16>, vector<8x1xf32> -> vector<8x1xf32>
    %c0_54 = arith.constant 0 : index
    %c0_55 = arith.constant 0 : index
    %c0_56 = arith.constant 0 : index
    %74 = vector.load %arg5[%c0_54, %c0_55, %c0_56] : memref<1x8x1xf32, #tpu.memory_space<vmem>>, vector<1x8x1xf32>
    %75 = vector.shape_cast %74 : vector<1x8x1xf32> to vector<8x1xf32>
    %76 = vector.shape_cast %73 : vector<8x1xf32> to vector<1x8x1xf32>
    tpu.vector_store %arg5[%c0_54, %c0_55, %c0_56], %76 {strides = array<i32>} : memref<1x8x1xf32, #tpu.memory_space<vmem>>, vector<1x8x1xf32>,
    return
  }
  func.func @transform_0(%arg0: i32) -> (i32, i32, i32) {
    %c0_i32 = arith.constant 0 : i32
    %c0_i32_0 = arith.constant 0 : i32
    %c0_i32_1 = arith.constant 0 : i32
    return %arg0, %c0_i32, %c0_i32_0 : i32, i32, i32
  }
  func.func @transform_1(%arg0: i32) -> (i32, i32) {
    %c0_i32 = arith.constant 0 : i32
    %c0_i32_0 = arith.constant 0 : i32
    %c0_i32_1 = arith.constant 0 : i32
    return %c0_i32, %c0_i32_0 : i32, i32
  }
  func.func @transform_2(%arg0: i32) -> (i32, i32) {
    %c0_i32 = arith.constant 0 : i32
    %c0_i32_0 = arith.constant 0 : i32
    %c0_i32_1 = arith.constant 0 : i32
    return %c0_i32, %c0_i32_0 : i32, i32
  }
  func.func @transform_3(%arg0: i32) -> (i32, i32) {
    %c0_i32 = arith.constant 0 : i32
    %c0_i32_0 = arith.constant 0 : i32
    %c0_i32_1 = arith.constant 0 : i32
    return %c0_i32, %c0_i32_0 : i32, i32
  }
  func.func @transform_4(%arg0: i32) -> (i32, i32, i32) {
    %c0_i32 = arith.constant 0 : i32
    %c0_i32_0 = arith.constant 0 : i32
    %c0_i32_1 = arith.constant 0 : i32
    return %arg0, %c0_i32, %c0_i32_0 : i32, i32, i32
  }
}

</mosaic_0001>

<bundles_post_ra>
// kernel: easy_model_forward.1
= control target key start
LH: loop header
LB: loop body
LE: loop exit
PB: predicated region body
PF: predicated region fallthrough
CT: control target
= control target key end

     0   :  { %s1391_s15 = smov 0   ;;  %s1518_s0 = inlined_call_operand.vmem [shape: f32[2,3,256], index: 0, kind: input, shape index: {}]   ;;  %s1519_s1 = inlined_call_operand.vmem [shape: bf16[8,36], index: 1, kind: input, shape index: {}]   ;;  %s1520_s2 = inlined_call_operand.vmem [shape: f32[8,1], index: 2, kind: input, shape index: {}]   ;;  %s1521_s3 = inlined_call_operand.vmem [shape: bf16[384,1], index: 3, kind: input, shape index: {}]   ;;  %s1522_s4 = inlined_call_operand.vmem [shape: f32[2,8,1], index: 4, kind: output, shape index: {}]  }
   0x1 LB: > { %s1110_s16 = sadd.s32 4294967295, %s1337_s15   ;;  %p1114_p0 = scmp.ge.s32.totalorder %s1337_s15, 1  ;;  %s1337_s15 = sphi %s1391_s15, %s14_s15  }
   0x2   : > { %p162_p1 = scmp.lt.s32.totalorder %s1337_s15, 3 }
   0x4   : > { %p163_p2 = pnand %p1114_p0, %p162_p1 }
   0x5   : > { %p187_p3 = scmp.lt.s32.totalorder (!%p163_p2), %s1110_s16, 1  ;;  %v1339_v0 = vmov (!%p163_p2), 0.0   ;;  %s1340_s21 = smov (!%p163_p2), 23   ;;  %vm204_vm0 = vcmask (!%p163_p2), 280728   ;;  %vm209_vm1 = vcmask (!%p163_p2), 428328   ;;  %vm214_vm2 = vcmask (!%p163_p2), 575928  }
   0x6   : > { %166 = sbr.rel (%p163_p2) target bundleno = 774 (0x306), region = 36  ;;  %197 = vst [vmem:[#allocation2] sm:$0xff] (!%p163_p2), %v1339_v0  ;;  %198 = vst [vmem:[#allocation2 + $0x8] sm:$0xff] (!%p163_p2), %v1339_v0  ;;  %1228 = vmatprep.subr.bf16.mxu1 (!%p163_p2), %v1339_v0  ;;  %s1341_s22 = smov (!%p163_p2), 19   ;;  %vm219_vm3 = vcmask (!%p163_p2), 723528   ;;  %vm224_vm4 = vcmask (!%p163_p2), 871128  }
   0x7   : > { %s1342_s23 = smov (!%p163_p2), 25   ;;  %s1343_s24 = smov (!%p163_p2), 21   ;;  %vm237_vm5 = vcmask (!%p163_p2), 1043448   ;;  %vm238_vm6 = vcmask (!%p163_p2), 120836   ;;  %vm234_vm7 = vcmask (!%p163_p2), 252928   ;;  %vm229_vm8 = vcmask (!%p163_p2), 1018728  }
   0x8   : > { %s1344_s25 = smov (!%p163_p2), 27   ;;  %s1345_s26 = smov (!%p163_p2), 31   ;;  %vm239_vm9 = vmor (!%p163_p2), %vm238_vm6, %vm237_vm5  ;;  %vm249_vm10 = vcmask (!%p163_p2), 285696   ;;  %vm244_vm11 = vcmask (!%p163_p2), 264328   ;;  %vm252_vm12 = vcmask (!%p163_p2), 411928   ;;  %vm257_vm13 = vcmask (!%p163_p2), 302080  }
   0x9   : > { %s1346_s27 = smov (!%p163_p2), 35   ;;  %s1347_s28 = smov (!%p163_p2), 29   ;;  %vm260_vm14 = vcmask (!%p163_p2), 559528   ;;  %vm273_vm15 = vcmask (!%p163_p2), 334848   ;;  %vm289_vm5 = vcmask (!%p163_p2), 367616   ;;  %vm281_vm6 = vcmask (!%p163_p2), 351232  }
   0xa   : > { %s1348_s29 = smov (!%p163_p2), 33   ;;  %s1349_s30 = smov (!%p163_p2), 37   ;;  %v1365_v44 = vmov (!%p163_p2), 0   ;;  %v636_v45 = vld [vmem:[%s1520_s2] sm:$0xff] (!%p163_p2) }
   0xb   : > { %s1350_s5 = smov (!%p163_p2), 41   ;;  %s1351_s6 = smov (!%p163_p2), 39   ;;  %728 = vmatprep.mubr.bf16.mxu0 (!%p163_p2), %v1365_v44  ;;  %1293 = vset.pattern.permute.xlu0 (!%p163_p2), %v1365_v44 }
   0xc   : > { %s1352_s7 = smov (!%p163_p2), 45   ;;  %s1353_s8 = smov (!%p163_p2), 43  }
   0xd   : > { %s1524_s16 = smov (!%p187_p3, %s1110_s16), 1  ;;  %s1354_s9 = smov 47  }
   0xe   : > { %s1174_s17 = sshll.u32 %s1524_s16, 3  ;;  %s1355_s10 = smov 49  }
   0xf   : > { %s191_s20 = scalar_lea.vmem %s1518_s0, %s1174_s17  ;;  %s1356_s11 = smov 126  }
  0x10   : > { %v199_v1 = vld [vmem:[%s191_s20] sm:$0x77]  ;;  %s1357_s12 = smov 109   ;;  %s1358_s13 = smov 92  }
  0x11   : > { %211 = vrot.lane.b32.xlu1 %v199_v1, %s1340_s21  ;;  %201 = vrot.lane.b32.xlu0 %v199_v1, %s1341_s22  ;;  %s1359_s14 = smov 127   ;;  %s1360_s18 = smov 110  }
  0x12   : > { %s1361_s19 = smov 108   ;;  %s1362_s20 = smov 91  }
  0x13   : > { %s1363_s21 = smov 90  }
  0x15   : > { %216 = vrot.lane.b32.xlu1 %v199_v1, %s1342_s23  ;;  %206 = vrot.lane.b32.xlu0 %v199_v1, %s1343_s24 }
  0x19   : > { %221 = vrot.lane.b32.xlu1 %v199_v1, %s1344_s25  ;;  %231 = vrot.lane.b32.xlu0 %v199_v1, %s1345_s26 }
  0x1d   : > { %246 = vrot.lane.b32.xlu1 %v199_v1, %s1346_s27  ;;  %226 = vrot.lane.b32.xlu0 %v199_v1, %s1347_s28 }
  0x21   : > { %241 = vrot.lane.b32.xlu1 %v199_v1, %s1348_s29  ;;  %254 = vrot.lane.b32.xlu0 %v199_v1, %s1349_s30  ;;  %s195_s30 = scalar_lea.vmem %s1522_s4, %s1174_s17 }
  0x25   : > { %270 = vrot.lane.b32.xlu1 %v199_v1, %s1350_s5  ;;  %262 = vrot.lane.b32.xlu0 %v199_v1, %s1351_s6 }
  0x29   : > { %286 = vrot.lane.b32.xlu1 %v199_v1, %s1352_s7  ;;  %278 = vrot.lane.b32.xlu0 %v199_v1, %s1353_s8 }
  0x2d   : > { %296 = vrot.lane.b32.xlu0 %v199_v1, %s1354_s9  ;;  %302 = vrot.lane.b32.xlu1 %v199_v1, %s1355_s10 }
  0x83   : > { %v212_v2 = vpop.permute.xlu1 %211  ;;  %v202_v3 = vpop.permute.xlu0 %201 }
  0x84   : > { %205 = vst.msk [vmem:[#allocation2] sm:$0x7] %vm204_vm0, %v202_v3  ;;  %vm265_vm0 = vcmask 318464  }
  0x87   : > { %v217_v4 = vpop.permute.xlu1 %216  ;;  %v207_v5 = vpop.permute.xlu0 %206 }
  0x88   : > { %210 = vst.msk [vmem:[#allocation2] sm:$0x7] %vm209_vm1, %v207_v5  ;;  %vm268_vm1 = vcmask 707128  }
  0x89   : > { %215 = vst.msk [vmem:[#allocation2] sm:$0x7] %vm214_vm2, %v212_v2  ;;  %vm276_vm2 = vcmask 854728  }
  0x8a   : > { %220 = vst.msk [vmem:[#allocation2] sm:$0x7] %vm219_vm3, %v217_v4  ;;  %vm292_vm3 = vcmask 1043432  }
  0x8b   : > { %v222_v6 = vpop.permute.xlu1 %221  ;;  %v232_v7 = vpop.permute.xlu0 %231 }
  0x8c   : > { %225 = vst.msk [vmem:[#allocation2] sm:$0x7] %vm224_vm4, %v222_v6  ;;  %v233_v8 = vrot.slane %v232_v7, 4  ;;  %vm293_vm4 = vcmask 104452  }
  0x8e   : > { %v235_v11 = vsel %vm234_vm7, %v233_v8, %v232_v7  ;;  %vm284_vm7 = vcmask 1002328  }
  0x8f   : > { %v247_v9 = vpop.permute.xlu1 %246  ;;  %v227_v10 = vpop.permute.xlu0 %226 }
  0x90   : > { %v248_v12 = vrot.slane %v247_v9, 4  ;;  %230 = vst.msk [vmem:[#allocation2] sm:$0x7] %vm229_vm8, %v227_v10  ;;  %vm294_vm8 = vmor %vm293_vm4, %vm292_vm3  ;;  %vm582_vm3 = vcmask 744448   ;;  %vm618_vm4 = vcmask 736256  }
  0x91   : > { %240 = vst.msk [vmem:[#allocation2] sm:$0x77] %vm239_vm9, %v235_v11  ;;  %vm300_vm9 = vcmask 247928  }
  0x92   : > { %v250_v15 = vsel %vm249_vm10, %v247_v9, %v248_v12  ;;  %vm306_vm10 = vcmask 395528  }
  0x93   : > { %v242_v13 = vpop.permute.xlu1 %241  ;;  %v255_v14 = vpop.permute.xlu0 %254 }
  0x94   : > { %245 = vst.msk [vmem:[#allocation2 + $0x4] sm:$0x7] %vm244_vm11, %v242_v13  ;;  %v256_v16 = vrot.slane %v255_v14, 4  ;;  %vm1364_vm11 = vmmov 0  }
  0x95   : > { %253 = vst.msk [vmem:[#allocation2 + $0x4] sm:$0x7] %vm252_vm12, %v250_v15  ;;  %1234 = vmatprep.mubr.msk.bf16.mxu1 %vm1364_vm11, %v1339_v0  ;;  %vm358_vm12 = vcmask 1043456  }
  0x96   : > { %v258_v17 = vsel %vm257_vm13, %v255_v14, %v256_v16  ;;  %vm396_vm13 = vcmask 1031168  }
  0x97   : > { %261 = vst.msk [vmem:[#allocation2 + $0x4] sm:$0x7] %vm260_vm14, %v258_v17  ;;  %v271_v18 = vpop.permute.xlu1 %270  ;;  %v263_v19 = vpop.permute.xlu0 %262  ;;  %vm470_vm14 = vcmask 891904  }
  0x98   : > { %v272_v20 = vrot.slane %v271_v18, 4  ;;  %v264_v21 = vrot.slane %v263_v19, 4 }
  0x9a   : > { %v274_v22 = vsel %vm273_vm15, %v271_v18, %v272_v20  ;;  %v266_v23 = vsel %vm265_vm0, %v263_v19, %v264_v21  ;;  %vm544_vm15 = vcmask 752640   ;;  %vm360_vm0 = vcmask 1039360  }
  0x9b   : > { %269 = vst.msk [vmem:[#allocation2 + $0x4] sm:$0x7] %vm268_vm1, %v266_v23  ;;  %v287_v24 = vpop.permute.xlu1 %286  ;;  %v279_v25 = vpop.permute.xlu0 %278  ;;  %vm434_vm1 = vcmask 900096  }
  0x9c   : > { %v288_v26 = vrot.slane %v287_v24, 4  ;;  %277 = vst.msk [vmem:[#allocation2 + $0x4] sm:$0x7] %vm276_vm2, %v274_v22  ;;  %v280_v27 = vrot.slane %v279_v25, 4  ;;  %vm508_vm2 = vcmask 883712  }
  0x9e   : > { %v290_v28 = vsel %vm289_vm5, %v287_v24, %v288_v26  ;;  %v282_v29 = vsel %vm281_vm6, %v279_v25, %v280_v27  ;;  %vm686_vm5 = vcmask 1041408   ;;  %vm682_vm6 = vcmask 293888  }
  0x9f   : > { %285 = vst.msk [vmem:[#allocation2 + $0x4] sm:$0x7] %vm284_vm7, %v282_v29  ;;  %v297_v30 = vpop.permute.xlu0 %296  ;;  %v303_v31 = vpop.permute.xlu1 %302  ;;  %vm1055_vm7 = vcmask 7168  }
  0xa0   : > { %295 = vst.msk [vmem:[#allocation2 + $0x4] sm:$0x77] %vm294_vm8, %v290_v28  ;;  %v298_v32 = vrot.slane %v297_v30, 4  ;;  %v304_v33 = vrot.slane %v303_v31, 4 }
  0xa2   : > { %301 = vst.msk [vmem:[#allocation2 + $0x8] sm:$0x7] %vm300_vm9, %v298_v32 }
  0xa3   : > { %307 = vst.msk [vmem:[#allocation2 + $0x8] sm:$0x7] %vm306_vm10, %v304_v33 }
  0xa7   : > { %v367_v34 = vld [vmem:[#allocation2] sm:$0xff] }
  0xa8   : > { %v371_v35 = vcombine.high %v367_v34, %v367_v34 }
  0xaa   : > { %v1179_v36 = vpack.c.bf16 %v371_v35, %v367_v34  ;;  %v368_v37 = vld [vmem:[#allocation2 + $0x8] sm:$0xff] }
  0xab   : > { %v309_v38 = vld [vmem:[#allocation2 + $0x8] sm:$0xf]  ;;  %v372_v39 = vcombine.high %v368_v37, %v368_v37 }
  0xac   : > { %v1176_v40 = vpack.c.bf16 %v309_v38, %v309_v38  ;;  %389 = vrot.lane.b32.xlu0 %v1179_v36, %s1356_s11  ;;  %326 = vst [vmem:[#allocation3] sm:$0x33] %v1179_v36  ;;  %v350_v42 = vrot.slane %v1179_v36, 6 }
  0xad   : > { %v1180_v41 = vpack.c.bf16 %v372_v39, %v368_v37 }
  0xae   : > { %327 = vst [vmem:[#allocation3 + $0x8] sm:$0x3] %v1176_v40 }
  0xaf   : > { %391 = vrot.lane.b32.xlu1 %v1180_v41, %s1356_s11  ;;  %v351_v43 = vrot.slane %v1180_v41, 6 }
  0xb0   : > { %463 = vrot.lane.b32.xlu0 %v1179_v36, %s1357_s12 }
  0xb3   : > { %465 = vrot.lane.b32.xlu1 %v1180_v41, %s1357_s12 }
  0xb4   : > { %537 = vrot.lane.b32.xlu0 %v1179_v36, %s1358_s13 }
  0xb7   : > { %539 = vrot.lane.b32.xlu1 %v1180_v41, %s1358_s13 }
  0xb8   : > { %352 = vrot.lane.b32.xlu0 %v350_v42, %s1359_s14 }
  0xbb   : > { %354 = vrot.lane.b32.xlu1 %v351_v43, %s1359_s14 }
  0xbc   : > { %427 = vrot.lane.b32.xlu0 %v350_v42, %s1360_s18 }
  0xbf   : > { %429 = vrot.lane.b32.xlu1 %v351_v43, %s1360_s18 }
  0xc0   : > { %501 = vrot.lane.b32.xlu0 %v350_v42, %s1361_s19 }
  0xc3   : > { %503 = vrot.lane.b32.xlu1 %v351_v43, %s1361_s19 }
  0xc4   : > { %575 = vrot.lane.b32.xlu0 %v350_v42, %s1362_s20 }
  0xc7   : > { %577 = vrot.lane.b32.xlu1 %v351_v43, %s1362_s20 }
  0xc8   : > { %611 = vrot.lane.b32.xlu0 %v1179_v36, %s1363_s21 }
  0xcb   : > { %613 = vrot.lane.b32.xlu1 %v1180_v41, %s1363_s21 }
  0xcc   : > { %639 = vperm.xlu0 %1293, %v636_v45  }
 0x11e   : > { %v390_v46 = vpop.permute.xlu0 %389 }
 0x11f   : > { %v393_v48 = vrot.slane %v390_v46, 4 }
 0x121   : > { %v392_v47 = vpop.permute.xlu1 %391 }
 0x122   : > { %v394_v49 = vrot.slane %v392_v47, 4  ;;  %v464_v50 = vpop.permute.xlu0 %463 }
 0x123   : > { %v467_v55 = vrot.slane %v464_v50, 4 }
 0x124   : > { %v395_v51 = vsel %vm358_vm12, %v393_v48, %v394_v49  ;;  %v398_v52 = vsel %vm396_vm13, %v392_v47, %v394_v49 }
 0x125   : > { %v397_v53 = vsel %vm396_vm13, %v390_v46, %v395_v51  ;;  %402 = vst [vmem:[#allocation3 + $0x14] sm:$0x3] %v398_v52  ;;  %v466_v54 = vpop.permute.xlu1 %465  ;;  %v625_v51 = vld [vmem:[%s1519_s1] sm:$0xf] }
 0x126   : > { %401 = vst [vmem:[#allocation3 + $0xc] sm:$0x33] %v397_v53  ;;  %v468_v56 = vrot.slane %v466_v54, 4  ;;  %v538_v57 = vpop.permute.xlu0 %537  ;;  %v1307_v52 = vld [vmem:[%s1521_s3 + $0x80] sm:$0xff]  }
 0x127   : > { %v541_v62 = vrot.slane %v538_v57, 4 }
 0x128   : > { %v469_v58 = vsel %vm358_vm12, %v467_v55, %v468_v56  ;;  %v472_v59 = vsel %vm470_vm14, %v466_v54, %v468_v56  ;;  %v1309_v54 = vld [vmem:[%s1521_s3] sm:$0xff]   ;;  %v1311_v55 = vld [vmem:[%s1521_s3 + $0x48] sm:$0xff]  }
 0x129   : > { %v471_v60 = vsel %vm470_vm14, %v464_v50, %v469_v58  ;;  %476 = vst [vmem:[#allocation3 + $0x20] sm:$0x3] %v472_v59  ;;  %v540_v61 = vpop.permute.xlu1 %539  ;;  %v1308_v50 = vld [vmem:[%s1521_s3 + $0x40] sm:$0xff]   ;;  %v1310_v56 = vld [vmem:[%s1521_s3 + $0x88] sm:$0xff]   ;;  %v1314_v58 = vld [vmem:[%s1521_s3 + $0x50] sm:$0xff]  }
 0x12a   : > { %475 = vst [vmem:[#allocation3 + $0x18] sm:$0x33] %v471_v60  ;;  %v542_v63 = vrot.slane %v540_v61, 4  ;;  %v353_v1 = vpop.permute.xlu0 %352  ;;  %v1313_v59 = vld [vmem:[%s1521_s3 + $0x90] sm:$0xff]  }
 0x12b   : > { %v356_v6 = vrot.slane %v353_v1, 4  ;;  %v1315_v60 = vld [vmem:[%s1521_s3 + $0x10] sm:$0xff]  }
 0x12c   : > { %v543_v2 = vsel %vm358_vm12, %v541_v62, %v542_v63  ;;  %v546_v3 = vsel %vm544_vm15, %v540_v61, %v542_v63  ;;  %v1317_v61 = vld [vmem:[%s1521_s3 + $0x58] sm:$0xff]  }
 0x12d   : > { %v545_v4 = vsel %vm544_vm15, %v538_v57, %v543_v2  ;;  %550 = vst [vmem:[#allocation3 + $0x2c] sm:$0x3] %v546_v3  ;;  %v355_v5 = vpop.permute.xlu1 %354  ;;  %v1312_v57 = vld [vmem:[%s1521_s3 + $0x8] sm:$0xff]   ;;  %v1316_v62 = vld [vmem:[%s1521_s3 + $0x98] sm:$0xff]   ;;  %v1319_v2 = vld [vmem:[%s1521_s3 + $0xa0] sm:$0xff]  }
 0x12e   : > { %549 = vst [vmem:[#allocation3 + $0x24] sm:$0x33] %v545_v4  ;;  %v357_v7 = vrot.slane %v355_v5, 4  ;;  %v428_v8 = vpop.permute.xlu0 %427  ;;  %v1318_v63 = vld [vmem:[%s1521_s3 + $0x18] sm:$0xff]   ;;  %v1321_v3 = vld [vmem:[%s1521_s3 + $0x20] sm:$0xff]   ;;  %v1323_v4 = vld [vmem:[%s1521_s3 + $0x68] sm:$0xff]  }
 0x12f   : > { %v431_v13 = vrot.slane %v428_v8, 4 }
 0x130   : > { %v359_v9 = vsel %vm358_vm12, %v356_v6, %v357_v7  ;;  %v362_v10 = vsel %vm360_vm0, %v355_v5, %v357_v7  ;;  %v1322_v5 = vld [vmem:[%s1521_s3 + $0xa8] sm:$0xff]   ;;  %v1325_v7 = vld [vmem:[%s1521_s3 + $0xb0] sm:$0xff]  }
 0x131   : > { %v361_v11 = vsel %vm360_vm0, %v353_v1, %v359_v9  ;;  %366 = vst [vmem:[#allocation3 + $0x8] sm:$0xc] %v362_v10  ;;  %v430_v12 = vpop.permute.xlu1 %429  ;;  %v1320_v1 = vld [vmem:[%s1521_s3 + $0x60] sm:$0xff]   ;;  %v1324_v6 = vld [vmem:[%s1521_s3 + $0x28] sm:$0xff]   ;;  %v1327_v9 = vld [vmem:[%s1521_s3 + $0x30] sm:$0xff]  }
 0x132   : > { %365 = vst [vmem:[#allocation3] sm:$0xcc] %v361_v11  ;;  %v432_v14 = vrot.slane %v430_v12, 4  ;;  %v502_v15 = vpop.permute.xlu0 %501  ;;  %v1328_v10 = vld [vmem:[%s1521_s3 + $0xb8] sm:$0xff]  }
 0x133   : > { %v505_v20 = vrot.slane %v502_v15, 4  ;;  %v1329_v11 = vld [vmem:[%s1521_s3 + $0x78] sm:$0xff]  }
 0x134   : > { %v433_v16 = vsel %vm358_vm12, %v431_v13, %v432_v14  ;;  %v436_v17 = vsel %vm434_vm1, %v430_v12, %v432_v14  ;;  %v1330_v12 = vld [vmem:[%s1521_s3 + $0x38] sm:$0xff]  }
 0x135   : > { %v435_v18 = vsel %vm434_vm1, %v428_v8, %v433_v16  ;;  %440 = vst [vmem:[#allocation3 + $0x14] sm:$0xc] %v436_v17  ;;  %v504_v19 = vpop.permute.xlu1 %503  ;;  %v1326_v8 = vld [vmem:[%s1521_s3 + $0x70] sm:$0xff]  }
 0x136   : > { %439 = vst [vmem:[#allocation3 + $0xc] sm:$0xcc] %v435_v18  ;;  %v506_v21 = vrot.slane %v504_v19, 4  ;;  %v576_v22 = vpop.permute.xlu0 %575 }
 0x137   : > { %v579_v27 = vrot.slane %v576_v22, 4 }
 0x138   : > { %v507_v23 = vsel %vm358_vm12, %v505_v20, %v506_v21  ;;  %v510_v24 = vsel %vm508_vm2, %v504_v19, %v506_v21 }
 0x139   : > { %v509_v25 = vsel %vm508_vm2, %v502_v15, %v507_v23  ;;  %514 = vst [vmem:[#allocation3 + $0x20] sm:$0xc] %v510_v24  ;;  %v578_v26 = vpop.permute.xlu1 %577 }
 0x13a   : > { %513 = vst [vmem:[#allocation3 + $0x18] sm:$0xcc] %v509_v25  ;;  %v580_v28 = vrot.slane %v578_v26, 4  ;;  %v612_v29 = vpop.permute.xlu0 %611 }
 0x13b   : > { %v615_v37 = vrot.slane %v612_v29, 4 }
 0x13c   : > { %v581_v30 = vsel %vm358_vm12, %v579_v27, %v580_v28  ;;  %v584_v31 = vsel %vm582_vm3, %v578_v26, %v580_v28  ;;  %v1296_v32 = vld [vmem:[#allocation3 + $0x8] ss:$12 sps:$4 sm:$0xff]  }
 0x13d   : > { %v583_v33 = vsel %vm582_vm3, %v576_v22, %v581_v30  ;;  %588 = vst [vmem:[#allocation3 + $0x2c] sm:$0xc] %v584_v31  ;;  %v614_v34 = vpop.permute.xlu1 %613  ;;  %v1297_v35 = vld [vmem:[#allocation3 + $0x4] ss:$12 sps:$4 sm:$0xff]   ;;  %v1299_v36 = vld [vmem:[#allocation3] ss:$12 sps:$4 sm:$0xff]   ;;  %1229 = vmatpush3.bf16.msra.mxu1 %v1296_v32 }
 0x13e   : > { %587 = vst [vmem:[#allocation3 + $0x24] sm:$0xcc] %v583_v33  ;;  %v616_v38 = vrot.slane %v614_v34, 4  ;;  %696 = vmatprep.subr.bf16.mxu0 %v1297_v35  ;;  %1230 = vmatprep.subr.bf16.mxu1 %v1339_v0 }
 0x13f   : > { %697 = vmatpush1.bf16.msra.mxu0 %v1299_v36 }
 0x140   : > { %v617_v39 = vsel %vm358_vm12, %v615_v37, %v616_v38  ;;  %v620_v40 = vsel %vm618_vm4, %v614_v34, %v616_v38 }
 0x141   : > { %v619_v41 = vsel %vm618_vm4, %v612_v29, %v617_v39  ;;  %624 = vst [vmem:[#allocation3 + $0x38] sm:$0x3] %v620_v40 }
 0x142   : > { %623 = vst [vmem:[#allocation3 + $0x30] sm:$0x33] %v619_v41 }
 0x144   : > { %v1300_v42 = vld [vmem:[#allocation3 + $0x20] ss:$12 sps:$4 sm:$0xff]  }
 0x145   : > { %v1301_v43 = vld [vmem:[#allocation3 + $0x1c] ss:$12 sps:$4 sm:$0xff]   ;;  %v1303_v44 = vld [vmem:[#allocation3 + $0x18] ss:$12 sps:$4 sm:$0xff]   ;;  %1231 = vmatpush3.bf16.msra.mxu1 %v1300_v42 }
 0x146   : > { %698 = vmatprep.subr.bf16.mxu0 %v1301_v43  ;;  %1232 = vmatprep.subr.bf16.mxu1 %v1339_v0 }
 0x147   : > { %699 = vmatpush1.bf16.msra.mxu0 %v1303_v44 }
 0x148   : > { %v1305_v45 = vld [vmem:[#allocation3 + $0x38] ss:$0 sps:$4 sm:$0x33]  }
 0x149   : > { %v634_v46 = vld [vmem:[#allocation3 + $0x30] sm:$0x33]  ;;  %v694_v48 = vsel %vm686_vm5, %v1305_v45, 0 }
 0x14a   : > { %v1143_v47 = vcombine.high %v634_v46, %v634_v46  ;;  %v1142_v49 = vcombine.low %v634_v46, %v634_v46  ;;  %1233 = vmatpush3.bf16.msra.mxu1 %v694_v48 }
 0x14b   : > { %1238 = vmatprep.subr.bf16.mxu1 %v1339_v0 }
 0x14c   : > { %1145 = vmatprep.subr.msk.bf16.mxu0 %vm686_vm5, %v1143_v47  ;;  %v688_v53 = vsel %vm686_vm5, %v1142_v49, 0 }
 0x14d   : > { %701 = vmatpush1.bf16.msra.mxu0 %v688_v53  ;;  %1235 = vmatmul.mubr.msk.bf16.vlgmr.msra.gmra.mrb[0].mxu1 %vm682_vm6, %v625_v51 }
 0x14e   : > { %1197 = vmatprep.subr.bf16.mxu0 %v1308_v50  ;;  %1239 = vmatpush3.bf16.msra.mxu1 %v1307_v52 }
 0x14f   : > { %1254 = vmatprep.mubr.msk.bf16.mxu1 %vm1364_vm11, %v1339_v0  ;;  %1240 = vmatprep.subr.bf16.mxu1 %v1339_v0 }
 0x150   : > { %1146 = vmatmul.mubr.msk.bf16.vlgmr.msra.gmra.mrb[0].mxu0 %vm682_vm6, %v625_v51 }
 0x151   : > { %1198 = vmatpush3.bf16.msra.mxu0 %v1309_v54 }
 0x152   : > { %1199 = vmatprep.subr.bf16.mxu0 %v1311_v55  ;;  %1241 = vmatpush3.bf16.msra.mxu1 %v1310_v56 }
 0x153   : > { %1242 = vmatprep.subr.bf16.mxu1 %v1339_v0 }
 0x155   : > { %1200 = vmatpush3.bf16.msra.mxu0 %v1312_v57 }
 0x156   : > { %1201 = vmatprep.subr.bf16.mxu0 %v1314_v58  ;;  %1243 = vmatpush3.bf16.msra.mxu1 %v1313_v59 }
 0x157   : > { %1244 = vmatprep.subr.bf16.mxu1 %v1339_v0 }
 0x159   : > { %1202 = vmatpush3.bf16.msra.mxu0 %v1315_v60 }
 0x15a   : > { %1203 = vmatprep.subr.bf16.mxu0 %v1317_v61  ;;  %1245 = vmatpush3.bf16.msra.mxu1 %v1316_v62 }
 0x15b   : > { %1246 = vmatprep.subr.bf16.mxu1 %v1339_v0 }
 0x15d   : > { %1204 = vmatpush3.bf16.msra.mxu0 %v1318_v63 }
 0x15e   : > { %1205 = vmatprep.subr.bf16.mxu0 %v1320_v1  ;;  %1247 = vmatpush3.bf16.msra.mxu1 %v1319_v2 }
 0x15f   : > { %1248 = vmatprep.subr.bf16.mxu1 %v1339_v0 }
 0x161   : > { %1206 = vmatpush3.bf16.msra.mxu0 %v1321_v3 }
 0x162   : > { %1207 = vmatprep.subr.bf16.mxu0 %v1323_v4  ;;  %1249 = vmatpush3.bf16.msra.mxu1 %v1322_v5 }
 0x163   : > { %1250 = vmatprep.subr.bf16.mxu1 %v1339_v0 }
 0x165   : > { %1208 = vmatpush3.bf16.msra.mxu0 %v1324_v6 }
 0x166   : > { %1251 = vmatpush3.bf16.msra.mxu1 %v1325_v7  ;;  %1209 = vmatprep.subr.bf16.mxu0 %v1326_v8 }
 0x167   : > { %1252 = vmatprep.subr.bf16.mxu1 %v1339_v0  ;;  %v640_v0 = vpop.permute.xlu0 %639 }
 0x169   : > { %1210 = vmatpush3.bf16.msra.mxu0 %v1327_v9 }
 0x16a   : > { %1253 = vmatpush3.bf16.msra.mxu1 %v1328_v10  ;;  %1211 = vmatprep.subr.bf16.mxu0 %v1329_v11 }
 0x16d   : > { %1212 = vmatpush3.bf16.msra.mxu0 %v1330_v12 }
 0x220   : > { %v771_v13 = vpop.f32.mrb[0].mxu1 }
 0x221   : > { %v772_v14 = vadd.f32 %v771_v13, %v640_v0  ;;  %v1236_v15 = vpop.f32.mrb[1].mxu1 }
 0x222   : > { %v774_v17 = vpop.f32.mrb[2].mxu1 }
 0x223   : > { %v730_v16 = vpop.f32.mrb[0].mxu0  ;;  %v779_v18 = vmax.f32 %v772_v14, 0.0  ;;  %v1237_v21 = vpop.f32.mrb[3].mxu1 }
 0x224   : > { %v731_v19 = vadd.f32 %v730_v16, %v640_v0  ;;  %v732_v20 = vpop.f32.mrb[1].mxu0 }
 0x225   : > { %v733_v22 = vadd.f32 %v732_v20, %v640_v0  ;;  %v734_v23 = vpop.f32.mrb[2].mxu0  ;;  %v782_v24 = vpack.c.bf16 %v779_v18, %v779_v18 }
 0x226   : > { %v777_v25 = vmax.f32 %v731_v19, 0.0  ;;  %v735_v26 = vpop.f32.mrb[3].mxu0 }
 0x227   : > { %v778_v27 = vmax.f32 %v733_v22, 0.0  ;;  %1255 = vmatmul.mubr.bf16.vlgmr.msra.gmra.mrb[4].mxu1 %v782_v24 }
 0x228   : > { %v780_v29 = vpack.c.bf16 %v777_v25, %v777_v25 }
 0x229   : > { %v781_v28 = vpack.c.bf16 %v778_v27, %v778_v27 }
 0x22b   : > { %1007 = vmatprep.mubr.bf16.mxu0 %v781_v28 }
 0x22c   : > { %1008 = vmatmul.mubr.bf16.vlgmr.msra.gmra.mrb[4].mxu0 %v780_v29 }
 0x2fa   : > { %v1049_v30 = vpop.f32.mrb[4].mxu1 }
 0x2fb   : > { %v1256_v31 = vpop.f32.mrb[5].mxu1 }
 0x2fc   : > { %v1052_v32 = vpop.f32.mrb[6].mxu1 }
 0x2fd   : > { %v1257_v33 = vpop.f32.mrb[7].mxu1 }
 0x2ff   : > { %v1213_v34 = vpop.f32.mrb[4].mxu0 }
 0x300   : > { %v1214_v35 = vpop.f32.mrb[5].mxu0 }
 0x301   : > { %v1215_v36 = vadd.f32 %v1214_v35, %v1213_v34  ;;  %v1216_v37 = vpop.f32.mrb[6].mxu0 }
 0x302   : > { %v1217_v38 = vpop.f32.mrb[7].mxu0 }
 0x303   : > { %v1050_v39 = vadd.f32 %v1215_v36, %v1049_v30 }
 0x305   : > { %1056 = vst.msk [vmem:[%s195_s30] sm:$0xff] %vm1055_vm7, %v1050_v39 }
 0x306 PF: > { %s14_s15 = sadd.s32 1, %s1337_s15  }
 0x307   : > { %p11_p4 = scmp.ge.s32.totalorder %s14_s15, 4  }
 0x309   :  { %13 = sbr.rel (!%p11_p4) target bundleno = 1 (0x1), region = 66 }

</bundles_post_ra>
